<compile_context>
chip_gen: v7x
topology: tpu7x:2x2x1
jax: 0.10.0
libtpu: 0.0.40
codegen_flags: <defaults>
</compile_context>

<pallas_src>
import functools

import jax
import jax.numpy as jnp
import numpy as np
from jax.experimental import pallas as pl
from jax.experimental.pallas import tpu as pltpu


def actor_kernel(x_ref, w1_ref, b1_ref, w2_ref, b2_ref, w3_ref, b3_ref,
                 out_ref, *, log_std_min, log_std_max, action_dim, obs_dim):
    A = action_dim
    mxu_dtype = w1_ref.dtype  # f32 by default; bf16 if caller opted in

    # single input slab [obs | noise]; static slices to split it
    obs = x_ref[:, :obs_dim]
    noise = x_ref[:, obs_dim:obs_dim + A]

    # trunk: Linear -> ReLU -> Linear -> ReLU -> Linear (fused 2A-wide head)
    h1 = jnp.dot(obs.astype(mxu_dtype), w1_ref[...],
                 preferred_element_type=jnp.float32) + b1_ref[...]
    h1 = jnp.maximum(h1, 0.0)
    h2 = jnp.dot(h1.astype(mxu_dtype), w2_ref[...],
                 preferred_element_type=jnp.float32) + b2_ref[...]
    h2 = jnp.maximum(h2, 0.0)
    head = jnp.dot(h2.astype(mxu_dtype), w3_ref[...],
                   preferred_element_type=jnp.float32) + b3_ref[...]

    mu = head[:, :A]          # chunk(2, dim=-1): first half
    ls_raw = head[:, A:]      # second half

    # log_std squashing / rescaling
    log_std = jnp.tanh(ls_raw)
    log_std = log_std_min + 0.5 * (log_std_max - log_std_min) * (log_std + 1.0)
    std = jnp.exp(log_std)

    # reparameterized sample
    pi = mu + noise * std

    # gaussian_logprob(noise, log_std)
    log_pi = jnp.sum(-0.5 * noise * noise - log_std, axis=-1, keepdims=True)
    log_pi = log_pi - 0.5 * float(np.log(2.0 * np.pi)) * float(A)

    # squash(mu, pi, log_pi)
    mu_t = jnp.tanh(mu)
    pi_t = jnp.tanh(pi)
    corr = jnp.log(jnp.maximum(1.0 - pi_t * pi_t, 0.0) + 1e-6)
    log_pi = log_pi - jnp.sum(corr, axis=-1, keepdims=True)

    # single unmasked full-block store of [ mu | pi | log_std | log_pi | pad ]
    rows = mu_t.shape[0]
    pad_w = out_ref.shape[1] - (3 * A + 1)
    parts = [mu_t, pi_t, log_std, log_pi]
    if pad_w > 0:
        parts.append(jnp.zeros((rows, pad_w), jnp.float32))
    out_ref[...] = jnp.concatenate(parts, axis=-1)


def _orthogonal(key, rows, cols):
    """Deterministic orthogonal init (matches nn.init.orthogonal_ semantics)."""
    n = max(rows, cols)
    a = jax.random.normal(key, (n, n), dtype=jnp.float32)
    q, r = jnp.linalg.qr(a)
    q = q * jnp.sign(jnp.diag(r))[None, :]
    return q[:rows, :cols]


def make_actor_params(key, obs_dim, action_dim, hidden_dim):
    k1, k2, k3 = jax.random.split(key, 3)
    # PyTorch Linear weight is [out, in]; we store transposed [in, out].
    w1 = _orthogonal(k1, hidden_dim, obs_dim).T          # [obs_dim, hidden]
    b1 = jnp.zeros((1, hidden_dim), jnp.float32)
    w2 = _orthogonal(k2, hidden_dim, hidden_dim).T       # [hidden, hidden]
    b2 = jnp.zeros((1, hidden_dim), jnp.float32)
    w3 = _orthogonal(k3, 2 * action_dim, hidden_dim).T   # [hidden, 2*action]
    b3 = jnp.zeros((1, 2 * action_dim), jnp.float32)
    return dict(w1=w1, b1=b1, w2=w2, b2=b2, w3=w3, b3=b3)


def actor_forward(params, obs, noise, *, log_std_min, log_std_max,
                  tile_b=None, use_bf16_mxu=False):
    B, obs_dim = obs.shape
    H = params["w1"].shape[1]
    A = params["w3"].shape[1] // 2

    if tile_b is None:
        # Single grid step for small batches; cap at 256 rows per step so the
        # narrow [tile_b, A] f32 temporaries stay well under the 64-vreg budget.
        tile_b = min(256, 8 * pl.cdiv(B, 8))
    assert tile_b % 8 == 0, "tile_b must be a multiple of 8 (sublane tiling)"

    # Number of grid steps; if >1, round up to even so v7x's two TensorCores
    # split the "parallel" batch axis without a 1-step imbalance.
    n_steps = pl.cdiv(B, tile_b)
    if n_steps > 1 and n_steps % 2 == 1:
        n_steps += 1
    B_pad = n_steps * tile_b

    # One input slab [obs | noise] -> one input DMA per tile.
    x = jnp.concatenate([obs, noise], axis=1)
    if B_pad != B:
        x = jnp.pad(x, ((0, B_pad - B), (0, 0)))

    # Lane-dense output slab width (multiple of 128 -> unmasked stores).
    out_w = 128 * pl.cdiv(3 * A + 1, 128)

    w1, w2, w3 = params["w1"], params["w2"], params["w3"]
    if use_bf16_mxu:
        # Optional v6e/v7x tweak: halves weight DMA/VMEM, doubles MXU rate.
        w1 = w1.astype(jnp.bfloat16)
        w2 = w2.astype(jnp.bfloat16)
        w3 = w3.astype(jnp.bfloat16)

    kernel = functools.partial(
        actor_kernel,
        log_std_min=float(log_std_min),
        log_std_max=float(log_std_max),
        action_dim=A,
        obs_dim=obs_dim,
    )

    def const_spec(shape):  # weights/biases: resident in VMEM across grid steps
        return pl.BlockSpec(shape, lambda i: (0, 0))

    out = pl.pallas_call(
        kernel,
        out_shape=jax.ShapeDtypeStruct((B_pad, out_w), jnp.float32),
        grid=(n_steps,),
        in_specs=[
            pl.BlockSpec((tile_b, obs_dim + A), lambda i: (i, 0)),  # [obs|noise]
            const_spec((obs_dim, H)),                               # w1
            const_spec((1, H)),                                     # b1
            const_spec((H, H)),                                     # w2
            const_spec((1, H)),                                     # b2
            const_spec((H, 2 * A)),                                 # w3 (fused)
            const_spec((1, 2 * A)),                                 # b3
        ],
        out_specs=pl.BlockSpec((tile_b, out_w), lambda i: (i, 0)),
        compiler_params=pltpu.CompilerParams(
            dimension_semantics=("parallel",),       # v7x: shard batch over 2 TCs
            vmem_limit_bytes=32 * 1024 * 1024),      # safe on v5e/v6e/v7x
    )(x, w1, params["b1"], w2, params["b2"], w3, params["b3"])

    mu = out[:B, 0:A]
    pi = out[:B, A:2 * A]
    log_std = out[:B, 2 * A:3 * A]
    log_pi = out[:B, 3 * A:3 * A + 1]
    return mu, pi, log_pi, log_std


if __name__ == "__main__":
    B, OBS_DIM, ACTION_DIM, HIDDEN = 20, 32, 4, 32   # B=20 exercises row padding
    LOG_STD_MIN, LOG_STD_MAX = -10.0, 2.0

    key = jax.random.PRNGKey(0)
    k_param, k_obs, k_noise = jax.random.split(key, 3)

    params = make_actor_params(k_param, OBS_DIM, ACTION_DIM, HIDDEN)
    obs = jax.random.normal(k_obs, (B, OBS_DIM), dtype=jnp.float32)
    # equivalent of torch.randn_like(mu), sampled deterministically in wrapper
    noise = jax.random.normal(k_noise, (B, ACTION_DIM), dtype=jnp.float32)

    # pure-JAX reference
    h1 = jnp.maximum(obs @ params["w1"] + params["b1"], 0.0)
    h2 = jnp.maximum(h1 @ params["w2"] + params["b2"], 0.0)
    head = h2 @ params["w3"] + params["b3"]
    mu_r, ls_raw = head[:, :ACTION_DIM], head[:, ACTION_DIM:]
    ls_r = jnp.tanh(ls_raw)
    ls_r = LOG_STD_MIN + 0.5 * (LOG_STD_MAX - LOG_STD_MIN) * (ls_r + 1.0)
    pi_r = mu_r + noise * jnp.exp(ls_r)
    lp_r = jnp.sum(-0.5 * noise ** 2 - ls_r, -1, keepdims=True) \
        - 0.5 * np.log(2 * np.pi) * ACTION_DIM
    pi_rt = jnp.tanh(pi_r)
    lp_r = lp_r - jnp.sum(jnp.log(jnp.maximum(1 - pi_rt ** 2, 0.0) + 1e-6),
                          -1, keepdims=True)

    # Check both the default single-step path and a multi-step (even-bumped)
    # grid path to exercise row padding + pipelined tiling.
    for tb in (None, 8):
        mu, pi, log_pi, log_std = actor_forward(
            params, obs, noise,
            log_std_min=LOG_STD_MIN, log_std_max=LOG_STD_MAX, tile_b=tb)
        jax.block_until_ready((mu, pi, log_pi, log_std))

        assert jnp.allclose(mu, jnp.tanh(mu_r), atol=1e-5)
        assert jnp.allclose(pi, pi_rt, atol=1e-5)
        assert jnp.allclose(log_pi, lp_r, atol=1e-4)
        assert jnp.allclose(log_std, ls_r, atol=1e-5)

    print("KERNEL_OK")
</pallas_src>

<mosaic_0001>
module attributes {stable_mosaic.version = 11 : i64} {
  func.func @actor_kernel(%arg0: i32, %arg1: memref<24x36xf32, #tpu.memory_space<vmem>>, %arg2: memref<32x32xf32, #tpu.memory_space<vmem>>, %arg3: memref<1x32xf32, #tpu.memory_space<vmem>>, %arg4: memref<32x32xf32, #tpu.memory_space<vmem>>, %arg5: memref<1x32xf32, #tpu.memory_space<vmem>>, %arg6: memref<32x8xf32, #tpu.memory_space<vmem>>, %arg7: memref<1x8xf32, #tpu.memory_space<vmem>>, %arg8: memref<24x128xf32, #tpu.memory_space<vmem>>) attributes {dimension_semantics = [#tpu.dimension_semantics<parallel>], iteration_bounds = array<i64: 1>, scalar_prefetch = 0 : i64, scratch_operands = 0 : i64, tpu.core_type = #tpu.core_type<tc>, window_params = [{transform_indices = @transform_0, window_bounds = array<i64: 24, 36>}, {pipeline_mode = #tpu.pipeline_mode<synchronous>, transform_indices = @transform_1, window_bounds = array<i64: 32, 32>}, {pipeline_mode = #tpu.pipeline_mode<synchronous>, transform_indices = @transform_2, window_bounds = array<i64: 1, 32>}, {pipeline_mode = #tpu.pipeline_mode<synchronous>, transform_indices = @transform_3, window_bounds = array<i64: 32, 32>}, {pipeline_mode = #tpu.pipeline_mode<synchronous>, transform_indices = @transform_4, window_bounds = array<i64: 1, 32>}, {pipeline_mode = #tpu.pipeline_mode<synchronous>, transform_indices = @transform_5, window_bounds = array<i64: 32, 8>}, {pipeline_mode = #tpu.pipeline_mode<synchronous>, transform_indices = @transform_6, window_bounds = array<i64: 1, 8>}, {transform_indices = @transform_7, window_bounds = array<i64: 24, 128>}]} {
    %c0 = arith.constant 0 : index
    %c0_0 = arith.constant 0 : index
    %0 = vector.load %arg1[%c0, %c0_0] : memref<24x36xf32, #tpu.memory_space<vmem>>, vector<24x32xf32>
    %c0_1 = arith.constant 0 : index
    %c32 = arith.constant 32 : index
    %1 = vector.load %arg1[%c0_1, %c32] : memref<24x36xf32, #tpu.memory_space<vmem>>, vector<24x4xf32>
    %c0_2 = arith.constant 0 : index
    %c0_3 = arith.constant 0 : index
    %2 = vector.load %arg2[%c0_2, %c0_3] : memref<32x32xf32, #tpu.memory_space<vmem>>, vector<32x32xf32>
    %cst = arith.constant dense<0.000000e+00> : vector<24x32xf32>
    %3 = tpu.matmul %0, %2, %cst {dimension_numbers = #tpu.dot_dimension_numbers<[1], [0], [0], [1], [0, 0, 1, 1], [], []>} : vector<24x32xf32>, vector<32x32xf32>, vector<24x32xf32> -> vector<24x32xf32>
    %c0_4 = arith.constant 0 : index
    %c0_5 = arith.constant 0 : index
    %4 = vector.load %arg3[%c0_4, %c0_5] : memref<1x32xf32, #tpu.memory_space<vmem>>, vector<1x32xf32>
    %5 = vector.broadcast %4 : vector<1x32xf32> to vector<24x32xf32>
    %6 = arith.addf %3, %5 : vector<24x32xf32>
    %cst_6 = arith.constant 0.000000e+00 : f32
    %7 = vector.broadcast %cst_6 : f32 to vector<24x32xf32>
    %8 = arith.maximumf %6, %7 : vector<24x32xf32>
    %c0_7 = arith.constant 0 : index
    %c0_8 = arith.constant 0 : index
    %9 = vector.load %arg4[%c0_7, %c0_8] : memref<32x32xf32, #tpu.memory_space<vmem>>, vector<32x32xf32>
    %cst_9 = arith.constant dense<0.000000e+00> : vector<24x32xf32>
    %10 = tpu.matmul %8, %9, %cst_9 {dimension_numbers = #tpu.dot_dimension_numbers<[1], [0], [0], [1], [0, 0, 1, 1], [], []>} : vector<24x32xf32>, vector<32x32xf32>, vector<24x32xf32> -> vector<24x32xf32>
    %c0_10 = arith.constant 0 : index
    %c0_11 = arith.constant 0 : index
    %11 = vector.load %arg5[%c0_10, %c0_11] : memref<1x32xf32, #tpu.memory_space<vmem>>, vector<1x32xf32>
    %12 = vector.broadcast %11 : vector<1x32xf32> to vector<24x32xf32>
    %13 = arith.addf %10, %12 : vector<24x32xf32>
    %cst_12 = arith.constant 0.000000e+00 : f32
    %14 = vector.broadcast %cst_12 : f32 to vector<24x32xf32>
    %15 = arith.maximumf %13, %14 : vector<24x32xf32>
    %c0_13 = arith.constant 0 : index
    %c0_14 = arith.constant 0 : index
    %16 = vector.load %arg6[%c0_13, %c0_14] : memref<32x8xf32, #tpu.memory_space<vmem>>, vector<32x8xf32>
    %cst_15 = arith.constant dense<0.000000e+00> : vector<24x8xf32>
    %17 = tpu.matmul %15, %16, %cst_15 {dimension_numbers = #tpu.dot_dimension_numbers<[1], [0], [0], [1], [0, 0, 1, 1], [], []>} : vector<24x32xf32>, vector<32x8xf32>, vector<24x8xf32> -> vector<24x8xf32>
    %c0_16 = arith.constant 0 : index
    %c0_17 = arith.constant 0 : index
    %18 = vector.load %arg7[%c0_16, %c0_17] : memref<1x8xf32, #tpu.memory_space<vmem>>, vector<1x8xf32>
    %19 = vector.broadcast %18 : vector<1x8xf32> to vector<24x8xf32>
    %20 = arith.addf %17, %19 : vector<24x8xf32>
    %21 = vector.extract_strided_slice %20 {offsets = [0, 0], sizes = [24, 4], strides = [1, 1]} : vector<24x8xf32> to vector<24x4xf32>
    %22 = vector.extract_strided_slice %20 {offsets = [0, 4], sizes = [24, 4], strides = [1, 1]} : vector<24x8xf32> to vector<24x4xf32>
    %23 = math.tanh %22 : vector<24x4xf32>
    %cst_18 = arith.constant 1.000000e+00 : f32
    %24 = vector.broadcast %cst_18 : f32 to vector<24x4xf32>
    %25 = arith.addf %23, %24 : vector<24x4xf32>
    %cst_19 = arith.constant 6.000000e+00 : f32
    %26 = vector.broadcast %cst_19 : f32 to vector<24x4xf32>
    %27 = arith.mulf %26, %25 : vector<24x4xf32>
    %cst_20 = arith.constant -1.000000e+01 : f32
    %28 = vector.broadcast %cst_20 : f32 to vector<24x4xf32>
    %29 = arith.addf %28, %27 : vector<24x4xf32>
    %30 = math.exp %29 : vector<24x4xf32>
    %31 = arith.mulf %1, %30 : vector<24x4xf32>
    %32 = arith.addf %21, %31 : vector<24x4xf32>
    %cst_21 = arith.constant -5.000000e-01 : f32
    %33 = vector.broadcast %cst_21 : f32 to vector<24x4xf32>
    %34 = arith.mulf %33, %1 : vector<24x4xf32>
    %35 = arith.mulf %34, %1 : vector<24x4xf32>
    %36 = arith.subf %35, %29 : vector<24x4xf32>
    %cst_22 = arith.constant dense<0.000000e+00> : vector<24xf32>
    %37 = vector.multi_reduction <add>, %36, %cst_22 [1] : vector<24x4xf32> to vector<24xf32>
    %38 = vector.shape_cast %37 : vector<24xf32> to vector<24x1xf32>
    %cst_23 = arith.constant 3.67575407 : f32
    %39 = vector.broadcast %cst_23 : f32 to vector<24x1xf32>
    %40 = arith.subf %38, %39 : vector<24x1xf32>
    %41 = math.tanh %21 : vector<24x4xf32>
    %42 = math.tanh %32 : vector<24x4xf32>
    %43 = arith.mulf %42, %42 : vector<24x4xf32>
    %cst_24 = arith.constant 1.000000e+00 : f32
    %44 = vector.broadcast %cst_24 : f32 to vector<24x4xf32>
    %45 = arith.subf %44, %43 : vector<24x4xf32>
    %cst_25 = arith.constant 0.000000e+00 : f32
    %46 = vector.broadcast %cst_25 : f32 to vector<24x4xf32>
    %47 = arith.maximumf %45, %46 : vector<24x4xf32>
    %cst_26 = arith.constant 9.99999997E-7 : f32
    %48 = vector.broadcast %cst_26 : f32 to vector<24x4xf32>
    %49 = arith.addf %47, %48 : vector<24x4xf32>
    %50 = math.log %49 : vector<24x4xf32>
    %cst_27 = arith.constant dense<0.000000e+00> : vector<24xf32>
    %51 = vector.multi_reduction <add>, %50, %cst_27 [1] : vector<24x4xf32> to vector<24xf32>
    %52 = vector.shape_cast %51 : vector<24xf32> to vector<24x1xf32>
    %53 = arith.subf %40, %52 : vector<24x1xf32>
    %cst_28 = arith.constant 0.000000e+00 : f32
    %54 = vector.broadcast %cst_28 : f32 to vector<24x115xf32>
    %55 = tpu.concatenate %41, %42, %29, %53, %54 in 1 : vector<24x4xf32>, vector<24x4xf32>, vector<24x4xf32>, vector<24x1xf32>, vector<24x115xf32> -> vector<24x128xf32>
    %c0_29 = arith.constant 0 : index
    %c0_30 = arith.constant 0 : index
    %56 = vector.load %arg8[%c0_29, %c0_30] : memref<24x128xf32, #tpu.memory_space<vmem>>, vector<24x128xf32>
    tpu.vector_store %arg8[%c0_29, %c0_30], %55 {strides = array<i32>} : memref<24x128xf32, #tpu.memory_space<vmem>>, vector<24x128xf32>,
    return
  }
  func.func @transform_0(%arg0: i32) -> (i32, i32) {
    %c0_i32 = arith.constant 0 : i32
    %c0_i32_0 = arith.constant 0 : i32
    return %arg0, %c0_i32 : i32, i32
  }
  func.func @transform_1(%arg0: i32) -> (i32, i32) {
    %c0_i32 = arith.constant 0 : i32
    %c0_i32_0 = arith.constant 0 : i32
    %c0_i32_1 = arith.constant 0 : i32
    return %c0_i32, %c0_i32_0 : i32, i32
  }
  func.func @transform_2(%arg0: i32) -> (i32, i32) {
    %c0_i32 = arith.constant 0 : i32
    %c0_i32_0 = arith.constant 0 : i32
    %c0_i32_1 = arith.constant 0 : i32
    return %c0_i32, %c0_i32_0 : i32, i32
  }
  func.func @transform_3(%arg0: i32) -> (i32, i32) {
    %c0_i32 = arith.constant 0 : i32
    %c0_i32_0 = arith.constant 0 : i32
    %c0_i32_1 = arith.constant 0 : i32
    return %c0_i32, %c0_i32_0 : i32, i32
  }
  func.func @transform_4(%arg0: i32) -> (i32, i32) {
    %c0_i32 = arith.constant 0 : i32
    %c0_i32_0 = arith.constant 0 : i32
    %c0_i32_1 = arith.constant 0 : i32
    return %c0_i32, %c0_i32_0 : i32, i32
  }
  func.func @transform_5(%arg0: i32) -> (i32, i32) {
    %c0_i32 = arith.constant 0 : i32
    %c0_i32_0 = arith.constant 0 : i32
    %c0_i32_1 = arith.constant 0 : i32
    return %c0_i32, %c0_i32_0 : i32, i32
  }
  func.func @transform_6(%arg0: i32) -> (i32, i32) {
    %c0_i32 = arith.constant 0 : i32
    %c0_i32_0 = arith.constant 0 : i32
    %c0_i32_1 = arith.constant 0 : i32
    return %c0_i32, %c0_i32_0 : i32, i32
  }
  func.func @transform_7(%arg0: i32) -> (i32, i32) {
    %c0_i32 = arith.constant 0 : i32
    %c0_i32_0 = arith.constant 0 : i32
    return %arg0, %c0_i32 : i32, i32
  }
}

</mosaic_0001>

<bundles_post_ra>
// kernel: tpu_custom_call.1
= control target key start
LH: loop header
LB: loop body
LE: loop exit
PB: predicated region body
PF: predicated region fallthrough
CT: control target
= control target key end

     0   :  { %12 = vsyncpa [#allocation3], 0  ;;  %s1000_s0 = inlined_call_operand.hbm [shape: f32[24,36], index: 0, kind: input, shape index: {}]   ;;  %s1001_s1 = inlined_call_operand.vmem [shape: f32[32,32], index: 1, kind: input, shape index: {}]   ;;  %s1002_s2 = inlined_call_operand.vmem [shape: f32[1,32], index: 2, kind: input, shape index: {}]   ;;  %s1003_s3 = inlined_call_operand.hbm [shape: f32[32,32], index: 3, kind: input, shape index: {}]   ;;  %s1004_s4 = inlined_call_operand.vmem [shape: f32[1,32], index: 4, kind: input, shape index: {}]   ;;  %s1005_s5 = inlined_call_operand.vmem [shape: f32[32,8], index: 5, kind: input, shape index: {}]   ;;  %s1006_s6 = inlined_call_operand.vmem [shape: f32[1,8], index: 6, kind: input, shape index: {}]   ;;  %s1007_s7 = inlined_call_operand.hbm [shape: f32[24,128], index: 7, kind: output, shape index: {}]  }
   0x1   :  { %13 = vsyncpa [#allocation6], 0 }
   0x2   :  { %14 = vsyncpa [#allocation4], 0  ;;  %s765_s24 = smov [#allocation2]   ;;  %s693_s28 = scalar_lea.hbm %s1000_s0, 384 }
   0x3   :  { %s20_s25 = sshll.u32 %s765_s24, 4  ;;  %p694_p0 = scmp.ne.s32.totalorder %s1000_s0, %s693_s28  ;;  %s21_s25 = int_to_ptr.vmem [resolvable:$true] %s20_s25 }
   0x4   :  { %p697_p1 = scmp.lt.u32.totalorder %s693_s28, %s1000_s0 }
   0x6   :  { %p699_p2 = pnand %p697_p1, %p694_p0 }
   0x8   :  { %702 = shalt.err (!%p699_p2)
}
   0x9   :  { %s703_s10 = scalar_lea.vmem %s21_s25, 384  ;;  %p708_p4 = scmp.lt.s32.totalorder %s21_s25, %s21_s25 }
   0xa   :  { %p704_p3 = scmp.ne.s32.totalorder %s21_s25, %s703_s10  ;;  %p709_p5 = scmp.lt.s32.totalorder %s703_s10, %s703_s10 }
   0xc   :  { %p710_p6 = por %p709_p5, %p708_p4 }
   0xe   :  { %p711_p7 = pnand %p710_p6, %p704_p3 }
  0x10   :  { %714 = shalt.err (!%p711_p7)
}
  0x11   :  { %s766_s11 = smov 128   ;;  %s767_s12 = smov 8  }
  0x12   :  { %26 = dma.hbm_to_vmem [thread:$0]  %s1000_s0, 384, %s21_s25, [#allocation3], %s766_s11, %s766_s11, %s767_s12  }
  0x13   :  { %s768_s15 = smov [#allocation5]   ;;  %s715_s19 = scalar_lea.hbm %s1003_s3, 512 }
  0x14   :  { %s36_s16 = sshll.u32 %s768_s15, 4  ;;  %p716_p8 = scmp.ne.s32.totalorder %s1003_s3, %s715_s19  ;;  %s37_s16 = int_to_ptr.vmem [resolvable:$true] %s36_s16 }
  0x15   :  { %p719_p9 = scmp.lt.u32.totalorder %s715_s19, %s1003_s3 }
  0x17   :  { %p721_p10 = pnand %p719_p9, %p716_p8 }
  0x19   :  { %724 = shalt.err (!%p721_p10)
}
  0x1a   :  { %s725_s24 = scalar_lea.vmem %s37_s16, 512  ;;  %p730_p12 = scmp.lt.s32.totalorder %s37_s16, %s37_s16 }
  0x1b   :  { %p726_p11 = scmp.ne.s32.totalorder %s37_s16, %s725_s24  ;;  %p731_p13 = scmp.lt.s32.totalorder %s725_s24, %s725_s24 }
  0x1d   :  { %p732_p0 = por %p731_p13, %p730_p12 }
  0x1f   :  { %p733_p1 = pnand %p732_p0, %p726_p11 }
  0x21   :  { %736 = shalt.err (!%p733_p1)
}
  0x22   :  { %42 = dma.hbm_to_vmem [thread:$0]  %s1003_s3, 512, %s37_s16, [#allocation6], %s766_s11, %s766_s11, %s767_s12  }
  0x23   :  { %759 = dma.done.wait [#allocation3], 384  }
  0x24   :  { %760 = vsyncadd [#allocation3], 4294966912 }
  0x25   :  { %761 = dma.done.wait [#allocation6], 512  }
  0x26   :  { %762 = vsyncadd [#allocation6], 4294966784  ;;  %v769_v0 = vmov 0.0|0.0   ;;  %vm770_vm0 = vmmov 0   ;;  %v771_v1 = vmov 0.0   ;;  %v58_v2 = vld [vmem:[%s1001_s1] sm:$0xff] }
  0x27   :  { %636 = vmatprep.subr.bf16.mxu0 %v769_v0  ;;  %654 = vmatprep.subr.bf16.mxu1 %v769_v0  ;;  %v59_v3 = vld [vmem:[%s1001_s1 + $0x8] sm:$0xff]  ;;  %v60_v4 = vld [vmem:[%s1001_s1 + $0x10] sm:$0xff]  ;;  %v61_v6 = vld [vmem:[%s1001_s1 + $0x18] sm:$0xff]  ;;  %vm69_vm1 = vcmask 261120   ;;  %s773_s22 = smov 4   ;;  %s774_s23 = smov 96  }
  0x28   :  { %593 = vmatprep.mubr.msk.f32.mxu0 %vm770_vm0, %v771_v1  ;;  %599 = vmatprep.mubr.msk.f32.mxu1 %vm770_vm0, %v771_v1  ;;  %v637_v5 = vpack.c.bf16 %v59_v3, %v58_v2  ;;  %v640_v7 = vpack.c.bf16 %v61_v6, %v60_v4  ;;  %v162_v8 = vld [vmem:[#allocation5] sm:$0xff]  ;;  %v163_v9 = vld [vmem:[#allocation5 + $0x8] sm:$0xff]  ;;  %v864_v11 = vld [vmem:[#allocation2 + $0x10] sm:$0xff]  ;;  %vm446_vm2 = vcmask 31744   ;;  %vm516_vm3 = vcmask 64512   ;;  %s775_s24 = smov [#allocation7]  }
  0x29   :  { %v862_v10 = vld [vmem:[#allocation2] sm:$0xff]  ;;  %v643_v12 = vpack.c.bf16 %v163_v9, %v162_v8  ;;  %v872_v13 = vld [vmem:[#allocation2 + $0x8] sm:$0xff]  ;;  %v165_v15 = vld [vmem:[#allocation5 + $0x18] sm:$0xff]  ;;  %vm520_vm4 = vcmask 97280   ;;  %vm524_vm5 = vcmask 105472   ;;  %s536_s0 = sshll.u32 %s775_s24, 4  ;;  %s537_s0 = int_to_ptr.vmem [resolvable:$true] %s536_s0 }
  0x2a   :  { %638 = vmatpush3.bf16.msra.mxu0 %v637_v5  ;;  %656 = vmatpush3.bf16.msra.mxu1 %v637_v5  ;;  %v164_v14 = vld [vmem:[#allocation5 + $0x10] sm:$0xff]  ;;  %v265_v17 = vld [vmem:[%s1005_s5] sm:$0xff]  ;;  %v267_v33 = vld [vmem:[%s1005_s5 + $0x10] sm:$0xff]  ;;  %s737_s25 = scalar_lea.vmem %s537_s0, 384  ;;  %p742_p3 = scmp.lt.s32.totalorder %s537_s0, %s537_s0 }
  0x2b   :  { %639 = vmatprep.subr.bf16.mxu0 %v769_v0  ;;  %655 = vmatprep.subr.bf16.mxu1 %v769_v0  ;;  %v646_v16 = vpack.c.bf16 %v165_v15, %v164_v14  ;;  %v266_v18 = vld [vmem:[%s1005_s5 + $0x8] sm:$0xff]  ;;  %v549_v20 = vld [vmem:[%s1002_s2] ss:$0 sm:$0xff]  ;;  %v268_v34 = vld [vmem:[%s1005_s5 + $0x18] sm:$0xff]  ;;  %p738_p2 = scmp.ne.s32.totalorder %s537_s0, %s737_s25  ;;  %p743_p4 = scmp.lt.s32.totalorder %s737_s25, %s737_s25 }
  0x2c   :  { %v649_v19 = vpack.c.bf16 %v266_v18, %v265_v17  ;;  %v652_v35 = vpack.c.bf16 %v268_v34, %v267_v33  ;;  %v553_v36 = vld [vmem:[%s1004_s4] ss:$0 sm:$0xff]  ;;  %v414_v17 = vmul.f32 -0.5, %v872_v13 }
  0x2d   :  { %v557_v49 = vld [vmem:[%s1006_s6] ss:$0 sm:$0xff]  ;;  %s772_s6 = smov 28   ;;  %p744_p5 = por %p743_p4, %p742_p3 }
  0x2e   :  { %641 = vmatpush3.bf16.msra.mxu0 %v640_v7  ;;  %657 = vmatpush3.bf16.msra.mxu1 %v640_v7 }
  0x2f   :  { %642 = vmatprep.subr.bf16.mxu1 %v769_v0  ;;  %648 = vmatprep.subr.bf16.mxu0 %v769_v0  ;;  %p745_p6 = pnand %p744_p5, %p738_p2 }
  0x31   :  { %594 = vmatmul.mubr.msk.f32.vlgmr.msra.gmra.mrb[0].mxu0 %vm69_vm1, %v862_v10  ;;  %600 = vmatmul.mubr.msk.f32.vlgmr.msra.gmra.mrb[0].mxu1 %vm69_vm1, %v864_v11 }
  0x32   :  { %596 = vmatprep.mubr.msk.f32.mxu0 %vm770_vm0, %v771_v1  ;;  %644 = vmatpush3.bf16.msra.mxu1 %v643_v12 }
  0x33   :  { %645 = vmatprep.subr.bf16.mxu1 %v769_v0  ;;  %610 = vmatprep.mubr.msk.f32.mxu1 %vm770_vm0, %v771_v1 }
  0x34   :  { %650 = vmatpush3.bf16.msra.mxu0 %v649_v19  ;;  %v417_v19 = vmul.f32 %v414_v17, %v872_v13 }
  0x35   :  { %597 = vmatmul.mubr.msk.f32.gmra.mrb[2].mxu0 %vm69_vm1, %v872_v13  ;;  %651 = vmatprep.subr.bf16.mxu0 %v769_v0 }
  0x36   :  { %627 = vmatprep.mubr.msk.f32.mxu0 %vm770_vm0, %v771_v1  ;;  %647 = vmatpush3.bf16.msra.mxu1 %v646_v16 }
  0x38   :  { %653 = vmatpush3.bf16.msra.mxu0 %v652_v35 }
 0x104   :  { %v145_v21 = vpop.f32.mrb[0].mxu0  ;;  %v155_v22 = vpop.f32.mrb[0].mxu1 }
 0x105   :  { %v146_v23 = vadd.f32 %v549_v20, %v145_v21  ;;  %v595_v24 = vpop.f32.mrb[1].mxu0  ;;  %v601_v25 = vpop.f32.mrb[1].mxu1  ;;  %v156_v30 = vadd.f32 %v549_v20, %v155_v22 }
 0x106   :  { %v415_v25 = vmul.f32 -0.5, %v864_v11 }
 0x107   :  { %v159_v26 = vmax.f32 %v146_v23, 0.0  ;;  %v161_v32 = vmax.f32 %v156_v30, 0.0 }
 0x108   :  { %v150_v27 = vpop.f32.mrb[2].mxu0 }
 0x109   :  { %v151_v28 = vadd.f32 %v549_v20, %v150_v27  ;;  %v598_v29 = vpop.f32.mrb[3].mxu0  ;;  %611 = vmatmul.mubr.msk.f32.vlgmr.msra.gmra.mrb[2].mxu1 %vm69_vm1, %v159_v26  ;;  %v413_v20 = vmul.f32 -0.5, %v862_v10 }
 0x10a   :  { %613 = vmatprep.mubr.msk.f32.mxu1 %vm770_vm0, %v771_v1  ;;  %v418_v29 = vmul.f32 %v415_v25, %v864_v11 }
 0x10b   :  { %v160_v31 = vmax.f32 %v151_v28, 0.0  ;;  %v416_v24 = vmul.f32 %v413_v20, %v862_v10 }
 0x10d   :  { %614 = vmatmul.mubr.msk.f32.gmra.mrb[4].mxu1 %vm69_vm1, %v160_v31 }
 0x10e   :  { %616 = vmatprep.mubr.msk.f32.mxu1 %vm770_vm0, %v771_v1 }
 0x111   :  { %617 = vmatmul.mubr.msk.f32.gmra.mrb[6].mxu1 %vm69_vm1, %v161_v32 }
 0x1dc   :  { %v248_v37 = vpop.f32.mrb[2].mxu1 }
 0x1dd   :  { %v249_v38 = vadd.f32 %v553_v36, %v248_v37  ;;  %v612_v39 = vpop.f32.mrb[3].mxu1 }
 0x1df   :  { %v262_v40 = vmax.f32 %v249_v38, 0.0 }
 0x1e0   :  { %v253_v41 = vpop.f32.mrb[4].mxu1 }
 0x1e1   :  { %v254_v42 = vadd.f32 %v553_v36, %v253_v41  ;;  %v615_v43 = vpop.f32.mrb[5].mxu1  ;;  %628 = vmatmul.mubr.msk.f32.vlgmr.msra.gmra.mrb[4].mxu0 %vm69_vm1, %v262_v40 }
 0x1e2   :  { %630 = vmatprep.mubr.msk.f32.mxu0 %vm770_vm0, %v771_v1 }
 0x1e3   :  { %v263_v44 = vmax.f32 %v254_v42, 0.0 }
 0x1e4   :  { %v258_v45 = vpop.f32.mrb[6].mxu1 }
 0x1e5   :  { %v259_v46 = vadd.f32 %v553_v36, %v258_v45  ;;  %v618_v47 = vpop.f32.mrb[7].mxu1  ;;  %631 = vmatmul.mubr.msk.f32.gmra.mrb[6].mxu0 %vm69_vm1, %v263_v44 }
 0x1e6   :  { %633 = vmatprep.mubr.msk.f32.mxu0 %vm770_vm0, %v771_v1 }
 0x1e7   :  { %v264_v48 = vmax.f32 %v259_v46, 0.0 }
 0x1e9   :  { %634 = vmatmul.mubr.msk.f32.gmra.mrb[8].mxu0 %vm69_vm1, %v264_v48 }
 0x2b4   :  { %v351_v50 = vpop.f32.mrb[4].mxu0 }
 0x2b5   :  { %v915_v51 = vadd.f32 %v557_v49, %v351_v50  ;;  %v629_v52 = vpop.f32.mrb[5].mxu0 }
 0x2b7   :  { %669 = vtanh.f32 %v915_v51 }
 0x2b8   :  { %v356_v53 = vpop.f32.mrb[6].mxu0 }
 0x2b9   :  { %v918_v54 = vadd.f32 %v557_v49, %v356_v53  ;;  %v632_v55 = vpop.f32.mrb[7].mxu0 }
 0x2bb   :  { %671 = vtanh.f32 %v918_v54 }
 0x2bc   :  { %v361_v56 = vpop.f32.mrb[8].mxu0 }
 0x2bd   :  { %v921_v57 = vadd.f32 %v557_v49, %v361_v56  ;;  %v635_v58 = vpop.f32.mrb[9].mxu0 }
 0x2bf   :  { %673 = vtanh.f32 %v921_v57 }
 0x2c1   :  { %v924_v59 = vpop.eup %669 }
 0x2c2   :  { %v368_v60 = vadd.f32 1.0, %v924_v59 }
 0x2c4   :  { %v371_v61 = vmul.f32 6.0, %v368_v60 }
 0x2c5   :  { %v927_v62 = vpop.eup %671 }
 0x2c6   :  { %v374_v63 = vadd.f32 -10.0, %v371_v61  ;;  %v369_v0 = vadd.f32 1.0, %v927_v62 }
 0x2c8   :  { %v372_v1 = vmul.f32 6.0, %v369_v0  ;;  %v377_v2 = vmul.f32 1.442695, %v374_v63 }
 0x2c9   :  { %v930_v3 = vpop.eup %673 }
 0x2ca   :  { %v932_v4 = vadd.f32 -10.0, %v372_v1  ;;  %v370_v5 = vadd.f32 1.0, %v930_v3  ;;  %675 = vpow2.f32 %v377_v2 }
 0x2cc   :  { %v379_v6 = vmul.f32 1.442695, %v932_v4  ;;  %v373_v7 = vmul.f32 6.0, %v370_v5 }
 0x2ce   :  { %677 = vpow2.f32 %v379_v6  ;;  %v936_v8 = vadd.f32 -10.0, %v373_v7 }
 0x2d0   :  { %v381_v9 = vmul.f32 1.442695, %v936_v8 }
 0x2d2   :  { %679 = vpow2.f32 %v381_v9 }
 0x2d4   :  { %v676_v12 = vpop.eup %675 }
 0x2d5   :  { %386 = vrot.lane.b32.xlu0 %v676_v12, %s772_s6 }
 0x2d8   :  { %v678_v14 = vpop.eup %677 }
 0x2d9   :  { %388 = vrot.lane.b32.xlu0 %v678_v14, %s772_s6 }
 0x2dc   :  { %v680_v15 = vpop.eup %679 }
 0x2dd   :  { %424 = vrot.lane.b32.xlu0 %v932_v4, %s772_s6  ;;  %390 = vrot.lane.b32.xlu1 %v680_v15, %s772_s6 }
 0x2e1   :  { %422 = vrot.lane.b32.xlu1 %v374_v63, %s772_s6 }
 0x2e5   :  { %426 = vrot.lane.b32.xlu1 %v936_v8, %s772_s6 }
 0x2e9   :  { %504 = vrot.lane.b32.xlu1 %v374_v63, %s773_s22 }
 0x347   :  { %v387_v16 = vpop.permute.xlu0 %386 }
 0x348   :  { %v395_v27 = vmul.f32 %v387_v16, %v862_v10 }
 0x34b   :  { %v389_v18 = vpop.permute.xlu0 %388 }
 0x34c   :  { %v396_v33 = vmul.f32 %v389_v18, %v872_v13 }
 0x34f   :  { %v425_v21 = vpop.permute.xlu0 %424  ;;  %v391_v22 = vpop.permute.xlu1 %390 }
 0x350   :  { %v432_v23 = vsub.f32 %v417_v19, %v425_v21  ;;  %v397_v31 = vmul.f32 %v391_v22, %v864_v11 }
 0x352   :  { %439 = vrot.lane.b32.xlu0 %v432_v23, %s774_s23 }
 0x353   :  { %v423_v26 = vpop.permute.xlu1 %422 }
 0x354   :  { %v431_v28 = vsub.f32 %v416_v24, %v423_v26 }
 0x356   :  { %401 = vrot.lane.b32.xlu0 %v395_v27, %s774_s23  ;;  %437 = vrot.lane.b32.xlu1 %v431_v28, %s774_s23 }
 0x357   :  { %v427_v30 = vpop.permute.xlu1 %426 }
 0x358   :  { %v433_v32 = vsub.f32 %v418_v29, %v427_v30 }
 0x35a   :  { %405 = vrot.lane.b32.xlu0 %v397_v31, %s774_s23  ;;  %441 = vrot.lane.b32.xlu1 %v433_v32, %s774_s23 }
 0x35b   :  { %v951_v34 = vpop.permute.xlu1 %504 }
 0x35e   :  { %403 = vrot.lane.b32.xlu1 %v396_v33, %s774_s23 }
 0x3c4   :  { %v440_v35 = vpop.permute.xlu0 %439 }
 0x3c5   :  { %v450_v10 = vsel %vm446_vm2, %v440_v35, 0.0 }
 0x3c6   :  { %451 = vadd.xlane.f32.xlu1 %v450_v10 }
 0x3c8   :  { %v402_v36 = vpop.permute.xlu0 %401  ;;  %v438_v37 = vpop.permute.xlu1 %437 }
 0x3c9   :  { %v410_v38 = vadd.f32 %v402_v36, %v915_v51  ;;  %v447_v39 = vsel %vm446_vm2, %v438_v37, 0.0 }
 0x3ca   :  { %448 = vadd.xlane.f32.xlu0 %v447_v39 }
 0x3cb   :  { %681 = vtanh.f32 %v410_v38 }
 0x3cc   :  { %v406_v11 = vpop.permute.xlu0 %405  ;;  %v442_v40 = vpop.permute.xlu1 %441 }
 0x3cd   :  { %v412_v13 = vadd.f32 %v406_v11, %v921_v57  ;;  %v453_v41 = vsel %vm446_vm2, %v442_v40, 0.0 }
 0x3ce   :  { %454 = vadd.xlane.f32.xlu0 %v453_v41 }
 0x3cf   :  { %683 = vtanh.f32 %v412_v13 }
 0x3d0   :  { %v404_v42 = vpop.permute.xlu1 %403 }
 0x3d1   :  { %v411_v43 = vadd.f32 %v404_v42, %v918_v54 }
 0x3d3   :  { %685 = vtanh.f32 %v411_v43 }
 0x3d5   :  { %v682_v44 = vpop.eup %681 }
 0x3d6   :  { %v462_v49 = vmul.f32 %v682_v44, %v682_v44 }
 0x3d7   :  { %495 = vrot.lane.b32.xlu1 %v682_v44, %s773_s22 }
 0x3d8   :  { %v465_v51 = vsub.f32 1.0, %v462_v49 }
 0x3d9   :  { %v684_v45 = vpop.eup %683 }
 0x3da   :  { %v464_v52 = vmul.f32 %v684_v45, %v684_v45  ;;  %v468_v55 = vmax.f32 %v465_v51, 0.0 }
 0x3db   :  { %499 = vrot.lane.b32.xlu1 %v684_v45, %s773_s22 }
 0x3dc   :  { %v467_v56 = vsub.f32 1.0, %v464_v52  ;;  %v471_v54 = vadd.f32 1e-06, %v468_v55 }
 0x3dd   :  { %v686_v46 = vpop.eup %685 }
 0x3de   :  { %v463_v47 = vmul.f32 %v686_v46, %v686_v46  ;;  %v470_v57 = vmax.f32 %v467_v56, 0.0 }
 0x3e0   :  { %v466_v48 = vsub.f32 1.0, %v463_v47  ;;  %v473_v58 = vadd.f32 1e-06, %v470_v57 }
 0x3e2   :  { %v469_v50 = vmax.f32 %v466_v48, 0.0 }
 0x3e4   :  { %497 = vrot.lane.b32.xlu0 %v686_v46, %s773_s22  ;;  %v472_v53 = vadd.f32 1e-06, %v469_v50 }
 0x3e6   :  { %687 = vlog2.f32 %v472_v53 }
 0x3e7   :  { %689 = vlog2.f32 %v471_v54 }
 0x3e8   :  { %691 = vlog2.f32 %v473_v58 }
 0x3f0   :  { %v688_v60 = vpop.eup %687 }
 0x3f1   :  { %v477_v61 = vmul.f32 0.6931472, %v688_v60  ;;  %v690_v63 = vpop.eup %689 }
 0x3f2   :  { %v475_v1 = vmul.f32 0.6931472, %v690_v63  ;;  %v692_v2 = vpop.eup %691 }
 0x3f3   :  { %v483_v0 = vsel %vm446_vm2, %v477_v61, 0.0  ;;  %v479_v6 = vmul.f32 0.6931472, %v692_v2 }
 0x3f4   :  { %v480_v5 = vsel %vm446_vm2, %v475_v1, 0.0 }
 0x3f5   :  { %v486_v7 = vsel %vm446_vm2, %v479_v6, 0.0 }
 0x3ff   :  { %484 = vadd.xlane.f32.xlu1 %v483_v0 }
 0x403   :  { %481 = vadd.xlane.f32.xlu0 %v480_v5 }
 0x407   :  { %487 = vadd.xlane.f32.xlu0 %v486_v7 }
 0x410   :  { %508 = vrot.lane.b32.xlu1 %v936_v8, %s773_s22 }
 0x41d   :  { %506 = vrot.lane.b32.xlu0 %v932_v4, %s773_s22 }
 0x453   :  { %v452_v9 = vpop.xlane.xlu1 %451 }
 0x457   :  { %v449_v12 = vpop.xlane.xlu0 %448  ;;  %v496_v14 = vpop.permute.xlu1 %495 }
 0x458   :  { %v561_v19 = vadd.f32 -3.675754, %v449_v12  ;;  %v513_v20 = vsel %vm446_vm2, %v924_v59, %v496_v14  ;;  %v562_v59 = vadd.f32 -3.675754, %v452_v9 }
 0x459   :  { %v517_v8 = vsel %vm516_vm3, %v513_v20, %v951_v34 }
 0x45b   :  { %v455_v15 = vpop.xlane.xlu0 %454  ;;  %v500_v16 = vpop.permute.xlu1 %499 }
 0x45c   :  { %v563_v4 = vadd.f32 -3.675754, %v455_v15  ;;  %v515_v27 = vsel %vm446_vm2, %v930_v3, %v500_v16 }
 0x45f   :  { %v498_v17 = vpop.permute.xlu0 %497 }
 0x460   :  { %v514_v31 = vsel %vm446_vm2, %v927_v62, %v498_v17 }
 0x48c   :  { %v485_v18 = vpop.xlane.xlu1 %484 }
 0x48d   :  { %v490_v32 = vsub.f32 %v562_v59, %v485_v18 }
 0x490   :  { %v482_v21 = vpop.xlane.xlu0 %481  ;;  %v509_v24 = vpop.permute.xlu1 %508 }
 0x491   :  { %v489_v22 = vsub.f32 %v561_v19, %v482_v21  ;;  %v519_v29 = vsel %vm516_vm3, %v515_v27, %v509_v24 }
 0x493   :  { %v521_v23 = vsel %vm520_vm4, %v517_v8, %v489_v22 }
 0x494   :  { %v525_v25 = vsel %vm524_vm5, %v521_v23, 0.0  ;;  %v488_v26 = vpop.xlane.xlu0 %487 }
 0x495   :  { %528 = vst [vmem:[#allocation7] sm:$0xff] %v525_v25  ;;  %v491_v28 = vsub.f32 %v563_v4, %v488_v26 }
 0x497   :  { %v523_v30 = vsel %vm520_vm4, %v519_v29, %v491_v28 }
 0x498   :  { %v527_v33 = vsel %vm524_vm5, %v523_v30, 0.0  ;;  %v507_v34 = vpop.permute.xlu0 %506 }
 0x499   :  { %530 = vst [vmem:[#allocation7 + $0x10] sm:$0xff] %v527_v33  ;;  %v518_v35 = vsel %vm516_vm3, %v514_v31, %v507_v34 }
 0x49a   :  { %v522_v3 = vsel %vm520_vm4, %v518_v35, %v490_v32 }
 0x49b   :  { %v526_v10 = vsel %vm524_vm5, %v522_v3, 0.0 }
 0x49c   :  { %529 = vst [vmem:[#allocation7 + $0x8] sm:$0xff] %v526_v10 }
 0x49d   :  { %748 = shalt.err (!%p745_p6)
}
 0x49e   :  { %s749_s3 = scalar_lea.hbm %s1007_s7, 384 }
 0x49f   :  { %p750_p7 = scmp.ne.s32.totalorder %s1007_s7, %s749_s3  ;;  %p753_p8 = scmp.lt.u32.totalorder %s749_s3, %s1007_s7 }
 0x4a1   :  { %p755_p9 = pnand %p753_p8, %p750_p7 }
 0x4a3   :  { %758 = shalt.err (!%p755_p9)
}
 0x4a4   :  { %542 = dma.vmem_to_hbm [thread:$0]  %s537_s0, 384, %s1007_s7, [#allocation4], %s766_s11, %s766_s11, %s767_s12  }
 0x4a5   :  { %763 = dma.done.wait [#allocation4], 384  }
 0x4a6   :  { %764 = vsyncadd [#allocation4], 4294966912 }
 0x4a7   :  { %546 = vsyncpa [#allocation3], 1 }
 0x4a8   :  { %547 = vsyncpa [#allocation6], 1 }
 0x4a9   :  { %548 = vsyncpa [#allocation4], 1 }

</bundles_post_ra>
